<compile_context>
chip_gen: v5e
topology: v5e:2x2
jax: 0.10.0
libtpu: 0.0.40
codegen_flags: <defaults>
</compile_context>

<pallas_src>
import functools

import jax
import jax.numpy as jnp
from jax.experimental import pallas as pl
from jax.experimental.pallas import tpu as pltpu

EPS = 1e-5
_LANE = 128
_TM_CEIL = 262144          # comfortable per-step ceiling on every generation


def _alpha_kernel(x_ref, w_ref, b_ref, o_ref, *, d_out):
    # x_ref: (3, S, 128) VMEM        w_ref: (3, d_out) SMEM
    # b_ref: (1, d_out)  SMEM        o_ref: (d_out + 1, S, 128) VMEM
    x0 = x_ref[0]                    # (S, 128) dense tiles
    x1 = x_ref[1]
    x2 = x_ref[2]

    # j == 0 peeled: coeff == 1, so h == 0.5 (a scalar) -> no ones-tensor and
    # no full-tile multiplies for the first row.
    z = w_ref[0, 0] * x0 + w_ref[1, 0] * x1 + w_ref[2, 0] * x2 + b_ref[0, 0]
    ht = 0.5 * jnp.tanh(z)           # tanh goes to the EUP slot (free)
    o_ref[0] = jnp.clip(0.5 + ht, EPS, 1.0 - EPS)
    coeff = 0.5 - ht

    for j in range(1, d_out):        # d_out is static -> unrolled
        # self.alpha(xyt): tiny Linear as scalar-broadcast FMAs on the VPU.
        z = (w_ref[0, j] * x0 + w_ref[1, j] * x1 + w_ref[2, j] * x2
             + b_ref[0, j])
        t = jnp.tanh(z)
        h = 0.5 * coeff
        ht = h * t
        # stick-breaking:  a*coeff == h + h*t,   coeff*(1-a) == h - h*t
        o_ref[j] = jnp.clip(h + ht, EPS, 1.0 - EPS)
        coeff = h - ht
    o_ref[d_out] = jnp.clip(coeff, EPS, 1.0 - EPS)


def _pick_tile(n, num_of_maps, tm_override=None):
    """Pick samples/grid-step (multiple of 1024) and an explicit VMEM limit."""
    kind = ""
    try:
        kind = jax.devices()[0].device_kind.lower()
    except Exception:
        pass
    if "v7" in kind:
        vmem_limit = 40 << 20   # 64 MiB physical VMEM per TC on v7x
        min_grid = 4            # keep both TensorCores busy via "parallel"
    else:
        vmem_limit = 48 << 20   # 128 MiB physical on v5e / v6e
        min_grid = 1

    if tm_override is not None:
        tm = max(1024, ((int(tm_override) + 1023) // 1024) * 1024)
        return tm, vmem_limit

    # Per-sample VMEM bytes: double-buffered I/O + in-kernel f32 temporaries
    # (x0/x1/x2 are materialized loads; z/t/h/ht/coeff are full (S,128) temps).
    per_sample = 2 * (3 * 4 + num_of_maps * 4) + (3 * 4 + 6 * 4)
    tm_big = int(vmem_limit * 0.7) // per_sample
    tm_big = max(1024, (tm_big // 1024) * 1024)
    tm_big = min(tm_big, _TM_CEIL)

    # >= min_grid grid steps (v7x 2-TC sharding); don't pad tiny N to a huge
    # tile either.
    tm_split = ((pl.cdiv(n, min_grid) + 1023) // 1024) * 1024
    n_1024 = ((n + 1023) // 1024) * 1024
    return max(1024, min(tm_big, tm_split, n_1024)), vmem_limit


def base_alpha_network_fmajor(x_t, w, b, *, tm=None):
    """Feature-major Pallas implementation of BaseAlphaNetwork.forward.

    x_t: (3, N) float32      (feature-major: no transpose passes needed)
    w:   (3, num_of_maps - 1) float32   (synthetic self.alpha weights)
    b:   (1, num_of_maps - 1) float32
    returns: (num_of_maps, N) float32
    """
    in_dim, n = x_t.shape
    assert in_dim == 3
    d_out = w.shape[1]
    assert d_out >= 1
    num_of_maps = d_out + 1

    tm, vmem_limit = _pick_tile(n, num_of_maps, tm)
    sub = tm // _LANE
    n_pad = pl.cdiv(n, tm) * tm
    grid = n_pad // tm

    x_t = x_t.astype(jnp.float32)
    if n_pad != n:
        x_t = jnp.pad(x_t, ((0, 0), (0, n_pad - n)))
    # Contiguous row-major reshape: pure metadata change, no extra HBM pass.
    x3 = x_t.reshape(in_dim, n_pad // _LANE, _LANE)

    kernel = functools.partial(_alpha_kernel, d_out=d_out)

    out3 = pl.pallas_call(
        kernel,
        out_shape=jax.ShapeDtypeStruct(
            (num_of_maps, n_pad // _LANE, _LANE), jnp.float32),
        grid_spec=pltpu.PrefetchScalarGridSpec(
            num_scalar_prefetch=0,
            grid=(grid,),
            in_specs=[
                pl.BlockSpec((in_dim, sub, _LANE), lambda i: (0, i, 0)),
                pl.BlockSpec(memory_space=pltpu.MemorySpace.SMEM),   # w
                pl.BlockSpec(memory_space=pltpu.MemorySpace.SMEM),   # b
            ],
            out_specs=pl.BlockSpec((num_of_maps, sub, _LANE),
                                   lambda i: (0, i, 0)),
        ),
        compiler_params=pltpu.CompilerParams(
            dimension_semantics=("parallel",),
            vmem_limit_bytes=vmem_limit),
    )(x3, w.astype(jnp.float32), b.astype(jnp.float32))

    out = out3.reshape(num_of_maps, n_pad)
    return out if n_pad == n else out[:, :n]


def base_alpha_network(xyt, w, b, *, tm=None):
    """PyTorch-interface wrapper: (N, 3) -> (N, num_of_maps).

    NOTE: the transposes here are extra full HBM passes for a memory-bound op;
    prefer base_alpha_network_fmajor when the caller can provide feature-major
    data / consume a feature-major result.
    """
    out_t = base_alpha_network_fmajor(xyt.astype(jnp.float32).T, w, b, tm=tm)
    return out_t.T


def _reference(xyt, w, b):
    """Pure-JAX reference mirroring the PyTorch forward."""
    z = xyt.astype(jnp.float32) @ w + b
    a = (jnp.tanh(z) + 1.0) * 0.5
    cols = [a[:, 0:1]]
    coeff = 1.0 - a[:, 0:1]
    for i in range(1, a.shape[-1]):
        cols.append(a[:, i:i + 1] * coeff)
        coeff = coeff * (1.0 - a[:, i:i + 1])
    cols.append(coeff)
    return jnp.clip(jnp.concatenate(cols, axis=-1), EPS, 1.0 - EPS)


if __name__ == "__main__":
    num_of_maps = 5          # -> output_dim = 4

    key = jax.random.PRNGKey(0)
    k_x, k_w, k_b = jax.random.split(key, 3)

    # TODO(synk): self.alpha is abstract in the base class; synthesized here as
    # a single deterministic Linear(3, num_of_maps - 1).
    w = jax.random.normal(k_w, (3, num_of_maps - 1), dtype=jnp.float32) * 0.5
    b = jax.random.normal(k_b, (1, num_of_maps - 1), dtype=jnp.float32) * 0.1

    # 1) Small, non-tile-aligned N through the PyTorch-interface wrapper.
    n = 300
    xyt = jax.random.normal(k_x, (n, 3), dtype=jnp.float32)
    out = jax.block_until_ready(base_alpha_network(xyt, w, b))
    ref = _reference(xyt, w, b)
    assert out.shape == (n, num_of_maps)
    assert jnp.allclose(out, ref, rtol=1e-5, atol=1e-5)

    # 2) Feature-major entry point with a forced small tile -> multi-step grid
    #    plus padding are exercised while shapes stay small.
    n2 = 2500
    xyt2 = jax.random.normal(k_x, (n2, 3), dtype=jnp.float32)
    out2_t = jax.block_until_ready(
        base_alpha_network_fmajor(xyt2.T, w, b, tm=1024))
    ref2 = _reference(xyt2, w, b)
    assert out2_t.shape == (num_of_maps, n2)
    assert jnp.allclose(out2_t.T, ref2, rtol=1e-5, atol=1e-5)

    print("KERNEL_OK")
</pallas_src>

<mosaic_0001>
module attributes {stable_mosaic.version = 11 : i64} {
  func.func @_alpha_kernel(%arg0: i32, %arg1: memref<3x8x128xf32, #tpu.memory_space<vmem>>, %arg2: memref<3x4xf32, #tpu.memory_space<smem>>, %arg3: memref<1x4xf32, #tpu.memory_space<smem>>, %arg4: memref<5x8x128xf32, #tpu.memory_space<vmem>>) attributes {dimension_semantics = [#tpu.dimension_semantics<parallel>], iteration_bounds = array<i64: 1>, scalar_prefetch = 0 : i64, scratch_operands = 0 : i64, tpu.core_type = #tpu.core_type<tc>, window_params = [{transform_indices = @transform_0, window_bounds = array<i64: 3, 8, 128>}, {transform_indices = @transform_1, window_bounds = array<i64: 3, 4>}, {transform_indices = @transform_2, window_bounds = array<i64: 1, 4>}, {transform_indices = @transform_3, window_bounds = array<i64: 5, 8, 128>}]} {
    %c0 = arith.constant 0 : index
    %c0_0 = arith.constant 0 : index
    %c0_1 = arith.constant 0 : index
    %0 = vector.load %arg1[%c0, %c0_0, %c0_1] : memref<3x8x128xf32, #tpu.memory_space<vmem>>, vector<1x8x128xf32>
    %1 = vector.shape_cast %0 : vector<1x8x128xf32> to vector<8x128xf32>
    %c1 = arith.constant 1 : index
    %c0_2 = arith.constant 0 : index
    %c0_3 = arith.constant 0 : index
    %2 = vector.load %arg1[%c1, %c0_2, %c0_3] : memref<3x8x128xf32, #tpu.memory_space<vmem>>, vector<1x8x128xf32>
    %3 = vector.shape_cast %2 : vector<1x8x128xf32> to vector<8x128xf32>
    %c2 = arith.constant 2 : index
    %c0_4 = arith.constant 0 : index
    %c0_5 = arith.constant 0 : index
    %4 = vector.load %arg1[%c2, %c0_4, %c0_5] : memref<3x8x128xf32, #tpu.memory_space<vmem>>, vector<1x8x128xf32>
    %5 = vector.shape_cast %4 : vector<1x8x128xf32> to vector<8x128xf32>
    %c0_6 = arith.constant 0 : index
    %c0_7 = arith.constant 0 : index
    %6 = memref.load %arg2[%c0_6, %c0_7] : memref<3x4xf32, #tpu.memory_space<smem>>
    %7 = vector.broadcast %6 : f32 to vector<8x128xf32>
    %8 = arith.mulf %7, %1 : vector<8x128xf32>
    %c1_8 = arith.constant 1 : index
    %c0_9 = arith.constant 0 : index
    %9 = memref.load %arg2[%c1_8, %c0_9] : memref<3x4xf32, #tpu.memory_space<smem>>
    %10 = vector.broadcast %9 : f32 to vector<8x128xf32>
    %11 = arith.mulf %10, %3 : vector<8x128xf32>
    %12 = arith.addf %8, %11 : vector<8x128xf32>
    %c2_10 = arith.constant 2 : index
    %c0_11 = arith.constant 0 : index
    %13 = memref.load %arg2[%c2_10, %c0_11] : memref<3x4xf32, #tpu.memory_space<smem>>
    %14 = vector.broadcast %13 : f32 to vector<8x128xf32>
    %15 = arith.mulf %14, %5 : vector<8x128xf32>
    %16 = arith.addf %12, %15 : vector<8x128xf32>
    %c0_12 = arith.constant 0 : index
    %c0_13 = arith.constant 0 : index
    %17 = memref.load %arg3[%c0_12, %c0_13] : memref<1x4xf32, #tpu.memory_space<smem>>
    %18 = vector.broadcast %17 : f32 to vector<8x128xf32>
    %19 = arith.addf %16, %18 : vector<8x128xf32>
    %20 = math.tanh %19 : vector<8x128xf32>
    %cst = arith.constant 5.000000e-01 : f32
    %21 = vector.broadcast %cst : f32 to vector<8x128xf32>
    %22 = arith.mulf %21, %20 : vector<8x128xf32>
    %cst_14 = arith.constant 5.000000e-01 : f32
    %23 = vector.broadcast %cst_14 : f32 to vector<8x128xf32>
    %24 = arith.addf %23, %22 : vector<8x128xf32>
    %cst_15 = arith.constant 9.99999974E-6 : f32
    %cst_16 = arith.constant 0.999989986 : f32
    %25 = vector.broadcast %cst_15 : f32 to vector<8x128xf32>
    %26 = arith.maximumf %25, %24 : vector<8x128xf32>
    %27 = vector.broadcast %cst_16 : f32 to vector<8x128xf32>
    %28 = arith.minimumf %27, %26 : vector<8x128xf32>
    %c0_17 = arith.constant 0 : index
    %c0_18 = arith.constant 0 : index
    %c0_19 = arith.constant 0 : index
    %29 = vector.load %arg4[%c0_17, %c0_18, %c0_19] : memref<5x8x128xf32, #tpu.memory_space<vmem>>, vector<1x8x128xf32>
    %30 = vector.shape_cast %29 : vector<1x8x128xf32> to vector<8x128xf32>
    %31 = vector.shape_cast %28 : vector<8x128xf32> to vector<1x8x128xf32>
    tpu.vector_store %arg4[%c0_17, %c0_18, %c0_19], %31 {strides = array<i32>} : memref<5x8x128xf32, #tpu.memory_space<vmem>>, vector<1x8x128xf32>,
    %cst_20 = arith.constant 5.000000e-01 : f32
    %32 = vector.broadcast %cst_20 : f32 to vector<8x128xf32>
    %33 = arith.subf %32, %22 : vector<8x128xf32>
    %c0_21 = arith.constant 0 : index
    %c1_22 = arith.constant 1 : index
    %34 = memref.load %arg2[%c0_21, %c1_22] : memref<3x4xf32, #tpu.memory_space<smem>>
    %35 = vector.broadcast %34 : f32 to vector<8x128xf32>
    %36 = arith.mulf %35, %1 : vector<8x128xf32>
    %c1_23 = arith.constant 1 : index
    %c1_24 = arith.constant 1 : index
    %37 = memref.load %arg2[%c1_23, %c1_24] : memref<3x4xf32, #tpu.memory_space<smem>>
    %38 = vector.broadcast %37 : f32 to vector<8x128xf32>
    %39 = arith.mulf %38, %3 : vector<8x128xf32>
    %40 = arith.addf %36, %39 : vector<8x128xf32>
    %c2_25 = arith.constant 2 : index
    %c1_26 = arith.constant 1 : index
    %41 = memref.load %arg2[%c2_25, %c1_26] : memref<3x4xf32, #tpu.memory_space<smem>>
    %42 = vector.broadcast %41 : f32 to vector<8x128xf32>
    %43 = arith.mulf %42, %5 : vector<8x128xf32>
    %44 = arith.addf %40, %43 : vector<8x128xf32>
    %c0_27 = arith.constant 0 : index
    %c1_28 = arith.constant 1 : index
    %45 = memref.load %arg3[%c0_27, %c1_28] : memref<1x4xf32, #tpu.memory_space<smem>>
    %46 = vector.broadcast %45 : f32 to vector<8x128xf32>
    %47 = arith.addf %44, %46 : vector<8x128xf32>
    %48 = math.tanh %47 : vector<8x128xf32>
    %cst_29 = arith.constant 5.000000e-01 : f32
    %49 = vector.broadcast %cst_29 : f32 to vector<8x128xf32>
    %50 = arith.mulf %49, %33 : vector<8x128xf32>
    %51 = arith.mulf %50, %48 : vector<8x128xf32>
    %52 = arith.addf %50, %51 : vector<8x128xf32>
    %cst_30 = arith.constant 9.99999974E-6 : f32
    %cst_31 = arith.constant 0.999989986 : f32
    %53 = vector.broadcast %cst_30 : f32 to vector<8x128xf32>
    %54 = arith.maximumf %53, %52 : vector<8x128xf32>
    %55 = vector.broadcast %cst_31 : f32 to vector<8x128xf32>
    %56 = arith.minimumf %55, %54 : vector<8x128xf32>
    %c1_32 = arith.constant 1 : index
    %c0_33 = arith.constant 0 : index
    %c0_34 = arith.constant 0 : index
    %57 = vector.load %arg4[%c1_32, %c0_33, %c0_34] : memref<5x8x128xf32, #tpu.memory_space<vmem>>, vector<1x8x128xf32>
    %58 = vector.shape_cast %57 : vector<1x8x128xf32> to vector<8x128xf32>
    %59 = vector.shape_cast %56 : vector<8x128xf32> to vector<1x8x128xf32>
    tpu.vector_store %arg4[%c1_32, %c0_33, %c0_34], %59 {strides = array<i32>} : memref<5x8x128xf32, #tpu.memory_space<vmem>>, vector<1x8x128xf32>,
    %60 = arith.subf %50, %51 : vector<8x128xf32>
    %c0_35 = arith.constant 0 : index
    %c2_36 = arith.constant 2 : index
    %61 = memref.load %arg2[%c0_35, %c2_36] : memref<3x4xf32, #tpu.memory_space<smem>>
    %62 = vector.broadcast %61 : f32 to vector<8x128xf32>
    %63 = arith.mulf %62, %1 : vector<8x128xf32>
    %c1_37 = arith.constant 1 : index
    %c2_38 = arith.constant 2 : index
    %64 = memref.load %arg2[%c1_37, %c2_38] : memref<3x4xf32, #tpu.memory_space<smem>>
    %65 = vector.broadcast %64 : f32 to vector<8x128xf32>
    %66 = arith.mulf %65, %3 : vector<8x128xf32>
    %67 = arith.addf %63, %66 : vector<8x128xf32>
    %c2_39 = arith.constant 2 : index
    %c2_40 = arith.constant 2 : index
    %68 = memref.load %arg2[%c2_39, %c2_40] : memref<3x4xf32, #tpu.memory_space<smem>>
    %69 = vector.broadcast %68 : f32 to vector<8x128xf32>
    %70 = arith.mulf %69, %5 : vector<8x128xf32>
    %71 = arith.addf %67, %70 : vector<8x128xf32>
    %c0_41 = arith.constant 0 : index
    %c2_42 = arith.constant 2 : index
    %72 = memref.load %arg3[%c0_41, %c2_42] : memref<1x4xf32, #tpu.memory_space<smem>>
    %73 = vector.broadcast %72 : f32 to vector<8x128xf32>
    %74 = arith.addf %71, %73 : vector<8x128xf32>
    %75 = math.tanh %74 : vector<8x128xf32>
    %cst_43 = arith.constant 5.000000e-01 : f32
    %76 = vector.broadcast %cst_43 : f32 to vector<8x128xf32>
    %77 = arith.mulf %76, %60 : vector<8x128xf32>
    %78 = arith.mulf %77, %75 : vector<8x128xf32>
    %79 = arith.addf %77, %78 : vector<8x128xf32>
    %cst_44 = arith.constant 9.99999974E-6 : f32
    %cst_45 = arith.constant 0.999989986 : f32
    %80 = vector.broadcast %cst_44 : f32 to vector<8x128xf32>
    %81 = arith.maximumf %80, %79 : vector<8x128xf32>
    %82 = vector.broadcast %cst_45 : f32 to vector<8x128xf32>
    %83 = arith.minimumf %82, %81 : vector<8x128xf32>
    %c2_46 = arith.constant 2 : index
    %c0_47 = arith.constant 0 : index
    %c0_48 = arith.constant 0 : index
    %84 = vector.load %arg4[%c2_46, %c0_47, %c0_48] : memref<5x8x128xf32, #tpu.memory_space<vmem>>, vector<1x8x128xf32>
    %85 = vector.shape_cast %84 : vector<1x8x128xf32> to vector<8x128xf32>
    %86 = vector.shape_cast %83 : vector<8x128xf32> to vector<1x8x128xf32>
    tpu.vector_store %arg4[%c2_46, %c0_47, %c0_48], %86 {strides = array<i32>} : memref<5x8x128xf32, #tpu.memory_space<vmem>>, vector<1x8x128xf32>,
    %87 = arith.subf %77, %78 : vector<8x128xf32>
    %c0_49 = arith.constant 0 : index
    %c3 = arith.constant 3 : index
    %88 = memref.load %arg2[%c0_49, %c3] : memref<3x4xf32, #tpu.memory_space<smem>>
    %89 = vector.broadcast %88 : f32 to vector<8x128xf32>
    %90 = arith.mulf %89, %1 : vector<8x128xf32>
    %c1_50 = arith.constant 1 : index
    %c3_51 = arith.constant 3 : index
    %91 = memref.load %arg2[%c1_50, %c3_51] : memref<3x4xf32, #tpu.memory_space<smem>>
    %92 = vector.broadcast %91 : f32 to vector<8x128xf32>
    %93 = arith.mulf %92, %3 : vector<8x128xf32>
    %94 = arith.addf %90, %93 : vector<8x128xf32>
    %c2_52 = arith.constant 2 : index
    %c3_53 = arith.constant 3 : index
    %95 = memref.load %arg2[%c2_52, %c3_53] : memref<3x4xf32, #tpu.memory_space<smem>>
    %96 = vector.broadcast %95 : f32 to vector<8x128xf32>
    %97 = arith.mulf %96, %5 : vector<8x128xf32>
    %98 = arith.addf %94, %97 : vector<8x128xf32>
    %c0_54 = arith.constant 0 : index
    %c3_55 = arith.constant 3 : index
    %99 = memref.load %arg3[%c0_54, %c3_55] : memref<1x4xf32, #tpu.memory_space<smem>>
    %100 = vector.broadcast %99 : f32 to vector<8x128xf32>
    %101 = arith.addf %98, %100 : vector<8x128xf32>
    %102 = math.tanh %101 : vector<8x128xf32>
    %cst_56 = arith.constant 5.000000e-01 : f32
    %103 = vector.broadcast %cst_56 : f32 to vector<8x128xf32>
    %104 = arith.mulf %103, %87 : vector<8x128xf32>
    %105 = arith.mulf %104, %102 : vector<8x128xf32>
    %106 = arith.addf %104, %105 : vector<8x128xf32>
    %cst_57 = arith.constant 9.99999974E-6 : f32
    %cst_58 = arith.constant 0.999989986 : f32
    %107 = vector.broadcast %cst_57 : f32 to vector<8x128xf32>
    %108 = arith.maximumf %107, %106 : vector<8x128xf32>
    %109 = vector.broadcast %cst_58 : f32 to vector<8x128xf32>
    %110 = arith.minimumf %109, %108 : vector<8x128xf32>
    %c3_59 = arith.constant 3 : index
    %c0_60 = arith.constant 0 : index
    %c0_61 = arith.constant 0 : index
    %111 = vector.load %arg4[%c3_59, %c0_60, %c0_61] : memref<5x8x128xf32, #tpu.memory_space<vmem>>, vector<1x8x128xf32>
    %112 = vector.shape_cast %111 : vector<1x8x128xf32> to vector<8x128xf32>
    %113 = vector.shape_cast %110 : vector<8x128xf32> to vector<1x8x128xf32>
    tpu.vector_store %arg4[%c3_59, %c0_60, %c0_61], %113 {strides = array<i32>} : memref<5x8x128xf32, #tpu.memory_space<vmem>>, vector<1x8x128xf32>,
    %114 = arith.subf %104, %105 : vector<8x128xf32>
    %cst_62 = arith.constant 9.99999974E-6 : f32
    %cst_63 = arith.constant 0.999989986 : f32
    %115 = vector.broadcast %cst_62 : f32 to vector<8x128xf32>
    %116 = arith.maximumf %115, %114 : vector<8x128xf32>
    %117 = vector.broadcast %cst_63 : f32 to vector<8x128xf32>
    %118 = arith.minimumf %117, %116 : vector<8x128xf32>
    %c4 = arith.constant 4 : index
    %c0_64 = arith.constant 0 : index
    %c0_65 = arith.constant 0 : index
    %119 = vector.load %arg4[%c4, %c0_64, %c0_65] : memref<5x8x128xf32, #tpu.memory_space<vmem>>, vector<1x8x128xf32>
    %120 = vector.shape_cast %119 : vector<1x8x128xf32> to vector<8x128xf32>
    %121 = vector.shape_cast %118 : vector<8x128xf32> to vector<1x8x128xf32>
    tpu.vector_store %arg4[%c4, %c0_64, %c0_65], %121 {strides = array<i32>} : memref<5x8x128xf32, #tpu.memory_space<vmem>>, vector<1x8x128xf32>,
    return
  }
  func.func @transform_0(%arg0: i32) -> (i32, i32, i32) {
    %c0_i32 = arith.constant 0 : i32
    %c0_i32_0 = arith.constant 0 : i32
    %c0_i32_1 = arith.constant 0 : i32
    return %c0_i32, %arg0, %c0_i32_0 : i32, i32, i32
  }
  func.func @transform_1(%arg0: i32) -> (i32, i32) {
    %c0_i32 = arith.constant 0 : i32
    %c0_i32_0 = arith.constant 0 : i32
    %c0_i32_1 = arith.constant 0 : i32
    return %c0_i32, %c0_i32_0 : i32, i32
  }
  func.func @transform_2(%arg0: i32) -> (i32, i32) {
    %c0_i32 = arith.constant 0 : i32
    %c0_i32_0 = arith.constant 0 : i32
    %c0_i32_1 = arith.constant 0 : i32
    return %c0_i32, %c0_i32_0 : i32, i32
  }
  func.func @transform_3(%arg0: i32) -> (i32, i32, i32) {
    %c0_i32 = arith.constant 0 : i32
    %c0_i32_0 = arith.constant 0 : i32
    %c0_i32_1 = arith.constant 0 : i32
    return %c0_i32, %arg0, %c0_i32_0 : i32, i32, i32
  }
}

</mosaic_0001>

<bundles_post_ra>
// kernel: tpu_custom_call.1
= control target key start
LH: loop header
LB: loop body
LE: loop exit
PB: predicated region body
PF: predicated region fallthrough
CT: control target
= control target key end

     0   :  { %8 = vsyncpa [#allocation3], 0  ;;  %s334_s0 = inlined_call_operand.hbm [shape: f32[3,8,128], index: 0, kind: input, shape index: {}]   ;;  %s335_s1 = inlined_call_operand.hbm [shape: f32[3,4], index: 1, kind: input, shape index: {}]   ;;  %s336_s2 = inlined_call_operand.vmem [shape: f32[1,4], index: 2, kind: input, shape index: {}]   ;;  %s337_s3 = inlined_call_operand.hbm [shape: f32[5,8,128], index: 3, kind: output, shape index: {}]  }
   0x1   :  { %9 = vsyncpa [#allocation5], 0 }
   0x2   :  { %10 = vsyncpa [#allocation6], 0 }
   0x3   :  { %11 = vsyncpa [#allocation4], 0  ;;  %s16_s14 = sshll.u32 %s334_s0, 4  ;;  %s284_s15 = smov [#allocation2]   ;;  %s17_s14 = int_to_ptr.hbm [resolvable:$true] %s16_s14 }
   0x4   :  { %s18_s16 = sshll.u32 %s284_s15, 4  ;;  %s30_s19 = sshll.u32 %s335_s1, 4  ;;  %s19_s16 = int_to_ptr.vmem [resolvable:$true] %s18_s16  ;;  %s31_s19 = int_to_ptr.hbm [resolvable:$true] %s30_s19 }
   0x5   :  { %s285_s20 = smov 128   ;;  %s286_s21 = smov 8  }
   0x6   :  { %24 = dma.hbm_to_vmem [thread:$0]  %s17_s14, 384, %s19_s16, [#allocation3], %s285_s20, %s285_s20, %s286_s21  }
   0x7   :  { %s287_s22 = smov [#allocation7]   ;;  %s39_s0 = sshll.u32 %s336_s2, 4  ;;  %s40_s0 = int_to_ptr.vmem [resolvable:$true] %s39_s0 }
   0x8   :  { %33 = dma.hbm_to_smem %s31_s19, 64, %s287_s22, [#allocation5]  }
   0x9   :  { %s288_s25 = smov [#allocation8]  }
   0xa   :  { %42 = dma.vmem_to_smem %s40_s0, 16, %s288_s25, [#allocation6]  }
   0xb   :  { %276 = dma.done.wait [#allocation3], 384  }
   0xc   :  { %277 = vsyncadd [#allocation3], 4294966912 }
   0xd   :  { %278 = dma.done.wait [#allocation5], 64  }
   0xe   :  { %279 = vsyncadd [#allocation5], 4294967232 }
   0xf   :  { %280 = dma.done.wait [#allocation6], 16  }
  0x10   :  { %281 = vsyncadd [#allocation6], 4294967280 }
  0x11   :  { %55 = sfence }
  0x12   :  { %s61_s1 = sld [smem:[#allocation7]]  ;;  %v56_v0 = vld [vmem:[#allocation2] sm:$0xff]  ;;  %v58_v1 = vld [vmem:[#allocation2 + $0x8] sm:$0xff]  ;;  %v60_v2 = vld [vmem:[#allocation2 + $0x10] sm:$0xff]  ;;  %s289_s13 = smov [#allocation9]  }
  0x13   :  { %s176_s26 = sld [smem:[#allocation7 + $0x80]]  ;;  %s159_s14 = sshll.u32 %s289_s13, 4  ;;  %s160_s14 = int_to_ptr.vmem [resolvable:$true] %s159_s14 }
  0x14   :  { %s177_s27 = sld [smem:[#allocation7 + $0x100]]  ;;  %s161_s17 = sshll.u32 %s337_s3, 4  ;;  %s162_s17 = int_to_ptr.hbm [resolvable:$true] %s161_s17 }
  0x15   :  { %s72_s28 = sld [smem:[#allocation8]] }
  0x16   :  { %s178_s29 = sld [smem:[#allocation7 + $0x1]] }
  0x17   :  { %s179_s30 = sld [smem:[#allocation7 + $0x81]] }
  0x18   :  { %v62_v3 = vstv %s61_s1  ;;  %s180_s2 = sld [smem:[#allocation7 + $0x101]] }
  0x19   :  { %v63_v4 = vmul.f32 %v62_v3, %v56_v0  ;;  %v65_v5 = vstv %s176_s26  ;;  %s322_s4 = sld [smem:[#allocation8 + $0x1]] }
  0x1a   :  { %v66_v6 = vmul.f32 %v65_v5, %v58_v1  ;;  %v69_v7 = vstv %s177_s27  ;;  %s182_s5 = sld [smem:[#allocation7 + $0x2]] }
  0x1b   :  { %v70_v8 = vmul.f32 %v69_v7, %v60_v2  ;;  %s183_s6 = sld [smem:[#allocation7 + $0x82]]  ;;  %v73_v11 = vstv %s72_s28 }
  0x1c   :  { %v67_v9 = vadd.f32 %v66_v6, %v63_v4  ;;  %v83_v10 = vstv %s178_s29  ;;  %s184_s7 = sld [smem:[#allocation7 + $0x102]] }
  0x1d   :  { %v84_v12 = vmul.f32 %v83_v10, %v56_v0  ;;  %v86_v13 = vstv %s179_s30  ;;  %s324_s8 = sld [smem:[#allocation8 + $0x2]] }
  0x1e   :  { %v71_v14 = vadd.f32 %v70_v8, %v67_v9  ;;  %v87_v15 = vmul.f32 %v86_v13, %v58_v1  ;;  %v90_v16 = vstv %s180_s2  ;;  %s186_s9 = sld [smem:[#allocation7 + $0x3]] }
  0x1f   :  { %v91_v17 = vmul.f32 %v90_v16, %v60_v2  ;;  %s187_s10 = sld [smem:[#allocation7 + $0x83]]  ;;  %v94_v21 = vstv %s322_s4 }
  0x20   :  { %v74_v18 = vadd.f32 %v73_v11, %v71_v14  ;;  %v88_v19 = vadd.f32 %v87_v15, %v84_v12  ;;  %v106_v20 = vstv %s182_s5  ;;  %s188_s11 = sld [smem:[#allocation7 + $0x103]] }
  0x21   :  { %v107_v22 = vmul.f32 %v106_v20, %v56_v0  ;;  %v109_v23 = vstv %s183_s6  ;;  %s189_s12 = sld [smem:[#allocation8 + $0x3]] }
  0x22   :  { %196 = vtanh.f32 %v74_v18  ;;  %v92_v24 = vadd.f32 %v91_v17, %v88_v19  ;;  %v110_v25 = vmul.f32 %v109_v23, %v58_v1  ;;  %v113_v26 = vstv %s184_s7 }
  0x23   :  { %v114_v27 = vmul.f32 %v113_v26, %v60_v2  ;;  %v117_v31 = vstv %s324_s8 }
  0x24   :  { %v95_v28 = vadd.f32 %v94_v21, %v92_v24  ;;  %v111_v29 = vadd.f32 %v110_v25, %v107_v22  ;;  %v129_v30 = vstv %s186_s9 }
  0x25   :  { %v130_v32 = vmul.f32 %v129_v30, %v56_v0  ;;  %v132_v33 = vstv %s187_s10 }
  0x26   :  { %198 = vtanh.f32 %v95_v28  ;;  %v115_v34 = vadd.f32 %v114_v27, %v111_v29  ;;  %v133_v35 = vmul.f32 %v132_v33, %v58_v1  ;;  %v136_v36 = vstv %s188_s11 }
  0x27   :  { %v137_v37 = vmul.f32 %v136_v36, %v60_v2  ;;  %v140_v45 = vstv %s189_s12 }
  0x28   :  { %v197_v38 = vpop.eup %196  ;;  %v118_v39 = vadd.f32 %v117_v31, %v115_v34  ;;  %v134_v40 = vadd.f32 %v133_v35, %v130_v32 }
  0x29   :  { %v76_v41 = vmul.f32 0.5, %v197_v38 }
  0x2a   :  { %v138_v42 = vadd.f32 %v137_v37, %v134_v40  ;;  %200 = vtanh.f32 %v118_v39 }
  0x2b   :  { %v77_v43 = vadd.f32 0.5, %v76_v41  ;;  %v81_v44 = vsub.f32 0.5, %v76_v41 }
  0x2c   :  { %v199_v46 = vpop.eup %198  ;;  %v141_v49 = vadd.f32 %v140_v45, %v138_v42 }
  0x2d   :  { %v78_v47 = vmax.f32 %v77_v43, 1e-05  ;;  %v97_v48 = vmul.f32 0.5, %v81_v44 }
  0x2e   :  { %202 = vtanh.f32 %v141_v49 }
  0x2f   :  { %v79_v50 = vmin.f32 %v78_v47, 0.99999  ;;  %v98_v51 = vmul.f32 %v199_v46, %v97_v48 }
  0x30   :  { %v201_v54 = vpop.eup %200 }
  0x31   :  { %80 = vst [vmem:[#allocation9] sm:$0xff] %v79_v50  ;;  %v99_v52 = vadd.f32 %v98_v51, %v97_v48  ;;  %v104_v53 = vsub.f32 %v97_v48, %v98_v51 }
  0x33   :  { %v100_v55 = vmax.f32 %v99_v52, 1e-05  ;;  %v120_v56 = vmul.f32 0.5, %v104_v53 }
  0x34   :  { %v203_v61 = vpop.eup %202 }
  0x35   :  { %v101_v57 = vmin.f32 %v100_v55, 0.99999  ;;  %v121_v58 = vmul.f32 %v201_v54, %v120_v56 }
  0x37   :  { %103 = vst [vmem:[#allocation9 + $0x8] sm:$0xff] %v101_v57  ;;  %v122_v59 = vadd.f32 %v121_v58, %v120_v56  ;;  %v127_v60 = vsub.f32 %v120_v56, %v121_v58 }
  0x39   :  { %v123_v62 = vmax.f32 %v122_v59, 1e-05  ;;  %v143_v63 = vmul.f32 0.5, %v127_v60 }
  0x3b   :  { %v124_v0 = vmin.f32 %v123_v62, 0.99999  ;;  %v144_v1 = vmul.f32 %v203_v61, %v143_v63 }
  0x3d   :  { %126 = vst [vmem:[#allocation9 + $0x10] sm:$0xff] %v124_v0  ;;  %v145_v2 = vadd.f32 %v144_v1, %v143_v63  ;;  %v150_v3 = vsub.f32 %v143_v63, %v144_v1 }
  0x3f   :  { %v146_v4 = vmax.f32 %v145_v2, 1e-05  ;;  %v151_v5 = vmax.f32 %v150_v3, 1e-05 }
  0x41   :  { %v147_v6 = vmin.f32 %v146_v4, 0.99999  ;;  %v152_v7 = vmin.f32 %v151_v5, 0.99999 }
  0x43   :  { %149 = vst [vmem:[#allocation9 + $0x18] sm:$0xff] %v147_v6 }
  0x44   :  { %154 = vst [vmem:[#allocation9 + $0x20] sm:$0xff] %v152_v7 }
  0x45   :  { %167 = dma.vmem_to_hbm [thread:$0]  %s160_s14, 640, %s162_s17, [#allocation4], %s285_s20, %s285_s20, %s286_s21  }
  0x46   :  { %282 = dma.done.wait [#allocation4], 640  }
  0x47   :  { %283 = vsyncadd [#allocation4], 4294966656 }
  0x48   :  { %172 = vsyncpa [#allocation3], 1 }
  0x49   :  { %173 = vsyncpa [#allocation4], 1 }
  0x4a   :  { %174 = vsyncpa [#allocation5], 1 }
  0x4b   :  { %175 = vsyncpa [#allocation6], 1 }

</bundles_post_ra>
